<compile_context>
chip_gen: v6e
topology: v6e:2x2x1
jax: 0.10.0
libtpu: 0.0.40
codegen_flags: <defaults>
</compile_context>

<pallas_src>
import functools

import jax
import jax.numpy as jnp
from jax.experimental import pallas as pl
from jax.experimental.pallas import tpu as pltpu

LANES = 128       # lane width (last dim)
TR_MAX = 1024     # max rows per grid step: 2 f32 streams * 2 bufs * 512KiB = 2MiB VMEM


def _round_up(x, m):
    return ((x + m - 1) // m) * m


def _focal_elementwise(x, t, *, gamma, alpha, logits):
    """Element-wise focal loss in f32 (x, t already f32)."""
    if logits:
        # numerically stable BCE-with-logits (matches torch semantics)
        bce = jnp.maximum(x, 0.0) - x * t + jnp.log1p(jnp.exp(-jnp.abs(x)))
    else:
        # TODO(synk): torch.binary_cross_entropy clamps log to >= -100; we clip
        # probabilities to [eps, 1-eps] instead (differs only at exact 0/1).
        eps = 1e-12
        xc = jnp.clip(x, eps, 1.0 - eps)
        bce = -(t * jnp.log(xc) + (1.0 - t) * jnp.log(1.0 - xc))

    pt = jnp.exp(-bce)
    a = alpha * t + (1.0 - alpha) * (1.0 - t)
    one_minus_pt = 1.0 - pt

    g = float(gamma)
    if g == int(g) and 0 <= int(g) <= 8:
        # integer-gamma fast path: multiply chain, no exp/log on the EUP
        gi = int(g)
        if gi == 0:
            mod = jnp.ones_like(one_minus_pt)
        else:
            mod = one_minus_pt
            for _ in range(gi - 1):
                mod = mod * one_minus_pt
    else:
        mod = jnp.power(one_minus_pt, g)

    return a * mod * bce


def _padding_mask(i, tr, n):
    """In-kernel mask for zero-padded tail elements (no HBM mask stream)."""
    rows_full = n // LANES
    rem = n % LANES
    row = jax.lax.broadcasted_iota(jnp.int32, (tr, LANES), 0)
    lane = jax.lax.broadcasted_iota(jnp.int32, (tr, LANES), 1)
    grow = i * tr + row
    mask = grow < rows_full
    if rem:
        mask = mask | ((grow == rows_full) & (lane < rem))
    return mask


def _focal_sum_kernel(pred_ref, target_ref, partial_ref, *,
                      gamma, alpha, logits, n, tr, need_mask):
    i = pl.program_id(0)
    x = pred_ref[...].astype(jnp.float32)
    t = target_ref[...].astype(jnp.float32)
    focal = _focal_elementwise(x, t, gamma=gamma, alpha=alpha, logits=logits)
    if need_mask:
        focal = jnp.where(_padding_mask(i, tr, n), focal, 0.0)
    # vreg-shaped partial: fold sublane groups with VPU adds; the single
    # cross-lane reduce is deferred to the wrapper (tiny).
    partial_ref[...] = jnp.sum(focal.reshape(tr // 8, 8, LANES), axis=0)


def _focal_map_kernel(pred_ref, target_ref, out_ref, *,
                      gamma, alpha, logits, loss_weight):
    x = pred_ref[...].astype(jnp.float32)
    t = target_ref[...].astype(jnp.float32)
    focal = _focal_elementwise(x, t, gamma=gamma, alpha=alpha, logits=logits)
    out_ref[...] = (focal * loss_weight).astype(out_ref.dtype)


def _prepare_2d(arr, rows_padded):
    flat = arr.reshape(-1)
    pad = rows_padded * LANES - flat.shape[0]
    if pad:
        flat = jnp.pad(flat, (0, pad))
    return flat.reshape(rows_padded, LANES)


def binary_focal_loss(pred, target, *, gamma=2.0, alpha=0.5, logits=True,
                      reduce=True, loss_weight=1.0):
    assert 0.0 < alpha < 1.0
    assert pred.shape == target.shape
    n = pred.size
    orig_shape = pred.shape

    # keep native float dtypes (no f32 upcast in HBM); only fix non-float inputs
    if not jnp.issubdtype(pred.dtype, jnp.floating):
        pred = pred.astype(jnp.float32)
    if not jnp.issubdtype(target.dtype, jnp.floating):
        target = target.astype(jnp.float32)

    rows_needed = -(-n // LANES)
    # TR multiple of 32 satisfies sublane-tiling rules for f32/bf16/fp16
    tr = min(TR_MAX, _round_up(rows_needed, 32))
    rows_padded = _round_up(rows_needed, tr)
    grid = rows_padded // tr
    pad_elems = rows_padded * LANES - n

    pred2 = _prepare_2d(pred, rows_padded)
    target2 = _prepare_2d(target, rows_padded)

    in_spec = pl.BlockSpec((tr, LANES), lambda i: (i, 0))
    cparams = pltpu.CompilerParams(dimension_semantics=("parallel",))

    if reduce:
        kern = functools.partial(
            _focal_sum_kernel,
            gamma=float(gamma), alpha=float(alpha), logits=bool(logits),
            n=int(n), tr=int(tr), need_mask=bool(pad_elems > 0))
        partials = pl.pallas_call(
            kern,
            out_shape=jax.ShapeDtypeStruct((grid * 8, LANES), jnp.float32),
            grid_spec=pltpu.PrefetchScalarGridSpec(
                num_scalar_prefetch=0,
                grid=(grid,),
                in_specs=[in_spec, in_spec],
                out_specs=pl.BlockSpec((8, LANES), lambda i: (i, 0)),
            ),
            compiler_params=cparams,
        )(pred2, target2)
        # tiny final reduction + mean scaling outside the kernel
        return jnp.sum(partials) * (float(loss_weight) / float(n))
    else:
        kern = functools.partial(
            _focal_map_kernel,
            gamma=float(gamma), alpha=float(alpha), logits=bool(logits),
            loss_weight=float(loss_weight))
        out2 = pl.pallas_call(
            kern,
            out_shape=jax.ShapeDtypeStruct((rows_padded, LANES), jnp.float32),
            grid_spec=pltpu.PrefetchScalarGridSpec(
                num_scalar_prefetch=0,
                grid=(grid,),
                in_specs=[in_spec, in_spec],
                out_specs=pl.BlockSpec((tr, LANES), lambda i: (i, 0)),
            ),
            compiler_params=cparams,
        )(pred2, target2)
        return out2.reshape(-1)[:n].reshape(orig_shape)


def binary_focal_loss_ref(pred, target, *, gamma=2.0, alpha=0.5, logits=True,
                          reduce=True, loss_weight=1.0):
    pred = pred.astype(jnp.float32)
    target = target.astype(jnp.float32)
    if logits:
        bce = jnp.maximum(pred, 0.0) - pred * target + jnp.log1p(
            jnp.exp(-jnp.abs(pred)))
    else:
        bce = -(target * jnp.log(pred) + (1 - target) * jnp.log(1 - pred))
    pt = jnp.exp(-bce)
    a = alpha * target + (1 - alpha) * (1 - target)
    focal = a * (1 - pt) ** gamma * bce
    if reduce:
        focal = jnp.mean(focal)
    return focal * loss_weight


if __name__ == "__main__":
    key = jax.random.PRNGKey(0)
    k1, k2 = jax.random.split(key)
    N = 2048
    pred = jax.random.normal(k1, (N,), dtype=jnp.float32)          # logits
    target = jax.random.bernoulli(k2, 0.3, (N,)).astype(jnp.float32)

    # reduced (default) path, integer gamma fast path
    out = binary_focal_loss(pred, target, gamma=2.0, alpha=0.5,
                            logits=True, reduce=True, loss_weight=1.0)
    out = jax.block_until_ready(out)
    ref = binary_focal_loss_ref(pred, target, gamma=2.0, alpha=0.5,
                                logits=True, reduce=True, loss_weight=1.0)
    assert jnp.allclose(out, ref, rtol=1e-5, atol=1e-6), (out, ref)

    # non-integer gamma (pow path), reduced
    out2 = binary_focal_loss(pred, target, gamma=1.5, alpha=0.25,
                             logits=True, reduce=True, loss_weight=2.0)
    out2 = jax.block_until_ready(out2)
    ref2 = binary_focal_loss_ref(pred, target, gamma=1.5, alpha=0.25,
                                 logits=True, reduce=True, loss_weight=2.0)
    assert jnp.allclose(out2, ref2, rtol=1e-5, atol=1e-6), (out2, ref2)

    # per-element (reduce=False) path
    out3 = binary_focal_loss(pred, target, gamma=2.0, alpha=0.5,
                             logits=True, reduce=False, loss_weight=1.0)
    out3 = jax.block_until_ready(out3)
    ref3 = binary_focal_loss_ref(pred, target, gamma=2.0, alpha=0.5,
                                 logits=True, reduce=False, loss_weight=1.0)
    assert out3.shape == (N,)
    assert jnp.allclose(out3, ref3, rtol=1e-5, atol=1e-6)

    print("KERNEL_OK")
</pallas_src>

<mosaic_0001>
module attributes {stable_mosaic.version = 11 : i64} {
  func.func @_focal_sum_kernel(%arg0: i32, %arg1: memref<32x128xf32, #tpu.memory_space<vmem>>, %arg2: memref<32x128xf32, #tpu.memory_space<vmem>>, %arg3: memref<8x128xf32, #tpu.memory_space<vmem>>) attributes {dimension_semantics = [#tpu.dimension_semantics<parallel>], iteration_bounds = array<i64: 1>, scalar_prefetch = 0 : i64, scratch_operands = 0 : i64, tpu.core_type = #tpu.core_type<tc>, window_params = [{transform_indices = @transform_0, window_bounds = array<i64: 32, 128>}, {transform_indices = @transform_1, window_bounds = array<i64: 32, 128>}, {transform_indices = @transform_2, window_bounds = array<i64: 8, 128>}]} {
    %c0 = arith.constant 0 : index
    %c0_0 = arith.constant 0 : index
    %0 = vector.load %arg1[%c0, %c0_0] : memref<32x128xf32, #tpu.memory_space<vmem>>, vector<32x128xf32>
    %c0_1 = arith.constant 0 : index
    %c0_2 = arith.constant 0 : index
    %1 = vector.load %arg2[%c0_1, %c0_2] : memref<32x128xf32, #tpu.memory_space<vmem>>, vector<32x128xf32>
    %cst = arith.constant 0.000000e+00 : f32
    %2 = vector.broadcast %cst : f32 to vector<32x128xf32>
    %3 = arith.maximumf %0, %2 : vector<32x128xf32>
    %4 = arith.mulf %0, %1 : vector<32x128xf32>
    %5 = arith.subf %3, %4 : vector<32x128xf32>
    %6 = math.absf %0 : vector<32x128xf32>
    %cst_3 = arith.constant 0.000000e+00 : f32
    %7 = vector.broadcast %cst_3 : f32 to vector<32x128xf32>
    %8 = arith.subf %7, %6 : vector<32x128xf32>
    %9 = math.exp %8 : vector<32x128xf32>
    %10 = math.log1p %9 : vector<32x128xf32>
    %11 = arith.addf %5, %10 : vector<32x128xf32>
    %cst_4 = arith.constant 0.000000e+00 : f32
    %12 = vector.broadcast %cst_4 : f32 to vector<32x128xf32>
    %13 = arith.subf %12, %11 : vector<32x128xf32>
    %14 = math.exp %13 : vector<32x128xf32>
    %cst_5 = arith.constant 5.000000e-01 : f32
    %15 = vector.broadcast %cst_5 : f32 to vector<32x128xf32>
    %16 = arith.mulf %15, %1 : vector<32x128xf32>
    %cst_6 = arith.constant 1.000000e+00 : f32
    %17 = vector.broadcast %cst_6 : f32 to vector<32x128xf32>
    %18 = arith.subf %17, %1 : vector<32x128xf32>
    %cst_7 = arith.constant 5.000000e-01 : f32
    %19 = vector.broadcast %cst_7 : f32 to vector<32x128xf32>
    %20 = arith.mulf %19, %18 : vector<32x128xf32>
    %21 = arith.addf %16, %20 : vector<32x128xf32>
    %cst_8 = arith.constant 1.000000e+00 : f32
    %22 = vector.broadcast %cst_8 : f32 to vector<32x128xf32>
    %23 = arith.subf %22, %14 : vector<32x128xf32>
    %24 = arith.mulf %23, %23 : vector<32x128xf32>
    %25 = arith.mulf %21, %24 : vector<32x128xf32>
    %26 = arith.mulf %25, %11 : vector<32x128xf32>
    %27 = tpu.iota {dimensions = array<i32: 0>} : vector<32x128xi32>
    %c32_i32 = arith.constant 32 : i32
    %28 = arith.muli %arg0, %c32_i32 : i32
    %29 = vector.broadcast %28 : i32 to vector<32x128xi32>
    %30 = arith.addi %29, %27 : vector<32x128xi32>
    %c16_i32 = arith.constant 16 : i32
    %31 = vector.broadcast %c16_i32 : i32 to vector<32x128xi32>
    %32 = arith.cmpi slt, %30, %31 : vector<32x128xi32>
    %cst_9 = arith.constant 0.000000e+00 : f32
    %33 = vector.broadcast %cst_9 : f32 to vector<32x128xf32>
    %34 = arith.select %32, %26, %33 : vector<32x128xi1>, vector<32x128xf32>
    %35 = vector.shape_cast %34 : vector<32x128xf32> to vector<4x8x128xf32>
    %cst_10 = arith.constant dense<0.000000e+00> : vector<8x128xf32>
    %36 = vector.multi_reduction <add>, %35, %cst_10 [0] : vector<4x8x128xf32> to vector<8x128xf32>
    %c0_11 = arith.constant 0 : index
    %c0_12 = arith.constant 0 : index
    %37 = vector.load %arg3[%c0_11, %c0_12] : memref<8x128xf32, #tpu.memory_space<vmem>>, vector<8x128xf32>
    tpu.vector_store %arg3[%c0_11, %c0_12], %36 {strides = array<i32>} : memref<8x128xf32, #tpu.memory_space<vmem>>, vector<8x128xf32>,
    return
  }
  func.func @transform_0(%arg0: i32) -> (i32, i32) {
    %c0_i32 = arith.constant 0 : i32
    %c0_i32_0 = arith.constant 0 : i32
    return %arg0, %c0_i32 : i32, i32
  }
  func.func @transform_1(%arg0: i32) -> (i32, i32) {
    %c0_i32 = arith.constant 0 : i32
    %c0_i32_0 = arith.constant 0 : i32
    return %arg0, %c0_i32 : i32, i32
  }
  func.func @transform_2(%arg0: i32) -> (i32, i32) {
    %c0_i32 = arith.constant 0 : i32
    %c0_i32_0 = arith.constant 0 : i32
    return %arg0, %c0_i32 : i32, i32
  }
}

</mosaic_0001>

<bundles_post_ra>
// kernel: tpu_custom_call.1
= control target key start
LH: loop header
LB: loop body
LE: loop exit
PB: predicated region body
PF: predicated region fallthrough
CT: control target
= control target key end

     0   :  { %7 = vsyncpa [#allocation3], 0  ;;  %s311_s0 = inlined_call_operand.hbm [shape: f32[32,128], index: 0, kind: input, shape index: {}]   ;;  %s312_s1 = inlined_call_operand.hbm [shape: f32[32,128], index: 1, kind: input, shape index: {}]   ;;  %s313_s2 = inlined_call_operand.hbm [shape: f32[8,128], index: 2, kind: output, shape index: {}]  }
   0x1   :  { %8 = vsyncpa [#allocation6], 0 }
   0x2   :  { %9 = vsyncpa [#allocation4], 0  ;;  %s282_s9 = smov [#allocation2]  }
   0x3   :  { %s15_s10 = sshll.u32 %s282_s9, 4  ;;  %s16_s10 = int_to_ptr.vmem [resolvable:$true] %s15_s10 }
   0x4   :  { %s224_s11 = scalar_lea.vmem %s16_s10, 512  ;;  %p229_p1 = scmp.lt.s32.totalorder %s16_s10, %s16_s10 }
   0x5   :  { %p225_p0 = scmp.ne.s32.totalorder %s16_s10, %s224_s11  ;;  %p230_p2 = scmp.lt.s32.totalorder %s224_s11, %s224_s11 }
   0x7   :  { %p231_p3 = por %p230_p2, %p229_p1 }
   0x9   :  { %p232_p4 = pnand %p231_p3, %p225_p0 }
   0xb   :  { %235 = shalt.err (!%p232_p4)
}
   0xc   :  { %s283_s12 = smov 128   ;;  %s284_s13 = smov 8  }
   0xd   :  { %21 = dma.hbm_to_vmem [thread:$0]  %s311_s0, 512, %s16_s10, [#allocation3], %s283_s12, %s283_s12, %s284_s13  }
   0xe   :  { %s285_s16 = smov [#allocation5]  }
   0xf   :  { %s27_s17 = sshll.u32 %s285_s16, 4  ;;  %s28_s17 = int_to_ptr.vmem [resolvable:$true] %s27_s17 }
  0x10   :  { %s244_s18 = scalar_lea.vmem %s28_s17, 512  ;;  %p249_p6 = scmp.lt.s32.totalorder %s28_s17, %s28_s17 }
  0x11   :  { %p245_p5 = scmp.ne.s32.totalorder %s28_s17, %s244_s18  ;;  %p250_p7 = scmp.lt.s32.totalorder %s244_s18, %s244_s18 }
  0x13   :  { %p251_p8 = por %p250_p7, %p249_p6 }
  0x15   :  { %p252_p9 = pnand %p251_p8, %p245_p5 }
  0x17   :  { %255 = shalt.err (!%p252_p9)
}
  0x18   :  { %33 = dma.hbm_to_vmem [thread:$0]  %s312_s1, 512, %s28_s17, [#allocation6], %s283_s12, %s283_s12, %s284_s13  }
  0x19   :  { %276 = dma.done.wait [#allocation3], 512  }
  0x1a   :  { %277 = vsyncadd [#allocation3], 4294966784 }
  0x1b   :  { %278 = dma.done.wait [#allocation6], 512  }
  0x1c   :  { %279 = vsyncadd [#allocation6], 4294966784  ;;  %v40_v0 = vld [vmem:[#allocation2] sm:$0xff]  ;;  %v41_v1 = vld [vmem:[#allocation2 + $0x8] sm:$0xff]  ;;  %s286_s0 = smov [#allocation7]  }
  0x1d   :  { %v60_v2 = vand.u32 2147483647, %v40_v0  ;;  %v61_v3 = vand.u32 2147483647, %v41_v1  ;;  %v44_v14 = vld [vmem:[#allocation5] sm:$0xff]  ;;  %v45_v15 = vld [vmem:[#allocation5 + $0x8] sm:$0xff] }
  0x1e   :  { %v48_v17 = vmax.f32 %v40_v0, 0.0  ;;  %v52_v18 = vmul.f32 %v44_v14, %v40_v0  ;;  %v49_v21 = vmax.f32 %v41_v1, 0.0  ;;  %v53_v22 = vmul.f32 %v45_v15, %v41_v1  ;;  %s189_s1 = sshll.u32 %s286_s0, 4  ;;  %s190_s1 = int_to_ptr.vmem [resolvable:$true] %s189_s1 }
  0x1f   :  { %v64_v4 = vsub.f32 0.0, %v60_v2  ;;  %v65_v5 = vsub.f32 0.0, %v61_v3  ;;  %v132_v40 = vsub.f32 1.0, %v44_v14  ;;  %v133_v41 = vsub.f32 1.0, %v45_v15  ;;  %s256_s21 = scalar_lea.vmem %s190_s1, 128  ;;  %p261_p11 = scmp.lt.s32.totalorder %s190_s1, %s190_s1 }
  0x20   :  { %v56_v26 = vsub.f32 %v48_v17, %v52_v18  ;;  %v57_v29 = vsub.f32 %v49_v21, %v53_v22  ;;  %v128_v42 = vmul.f32 0.5, %v44_v14  ;;  %v129_v44 = vmul.f32 0.5, %v45_v15  ;;  %p257_p10 = scmp.ne.s32.totalorder %s190_s1, %s256_s21  ;;  %p262_p12 = scmp.lt.s32.totalorder %s256_s21, %s256_s21 }
  0x21   :  { %v68_v6 = vmul.f32 1.442695, %v64_v4  ;;  %v70_v7 = vmul.f32 1.442695, %v65_v5  ;;  %v136_v43 = vmul.f32 0.5, %v132_v40  ;;  %v137_v45 = vmul.f32 0.5, %v133_v41 }
  0x22   :  { %p263_p13 = por %p262_p12, %p261_p11 }
  0x23   :  { %204 = vpow2.f32 %v68_v6  ;;  %v140_v48 = vadd.f32 %v136_v43, %v128_v42  ;;  %v141_v50 = vadd.f32 %v137_v45, %v129_v44 }
  0x24   :  { %206 = vpow2.f32 %v70_v7  ;;  %p264_p0 = pnand %p263_p13, %p257_p10 }
  0x30   :  { %v205_v8 = vpop.eup %204 }
  0x31   :  { %v207_v9 = vpop.eup %206  ;;  %v76_v10 = vadd.f32 1.0, %v205_v8  ;;  %v79_v12 = vmul.f32 -0.5, %v205_v8  ;;  %v82_v19 = vand.u32 2147483647, %v205_v8 }
  0x32   :  { %v85_v11 = vadd.f32 1.0, %v207_v9  ;;  %v88_v13 = vmul.f32 -0.5, %v207_v9  ;;  %v91_v23 = vand.u32 2147483647, %v207_v9 }
  0x33   :  { %208 = vlog2.f32 %v76_v10  ;;  %v80_v16 = vadd.f32 1.0, %v79_v12  ;;  %vm83_vm0 = vcmp.lt.f32.partialorder %v82_v19, 0.0004427343 }
  0x34   :  { %210 = vlog2.f32 %v85_v11  ;;  %v89_v20 = vadd.f32 1.0, %v88_v13  ;;  %vm92_vm1 = vcmp.lt.f32.partialorder %v91_v23, 0.0004427343 }
  0x35   :  { %v81_v24 = vmul.f32 %v205_v8, %v80_v16 }
  0x36   :  { %v90_v27 = vmul.f32 %v207_v9, %v89_v20 }
  0x40   :  { %v209_v25 = vpop.eup %208 }
  0x41   :  { %v211_v28 = vpop.eup %210  ;;  %v78_v30 = vmul.f32 0.6931472, %v209_v25 }
  0x42   :  { %v87_v31 = vmul.f32 0.6931472, %v211_v28 }
  0x43   :  { %v84_v32 = vsel %vm83_vm0, %v81_v24, %v78_v30 }
  0x44   :  { %v93_v33 = vsel %vm92_vm1, %v90_v27, %v87_v31  ;;  %v112_v34 = vadd.f32 %v84_v32, %v56_v26 }
  0x45   :  { %v113_v35 = vadd.f32 %v93_v33, %v57_v29 }
  0x46   :  { %v116_v36 = vsub.f32 0.0, %v112_v34 }
  0x47   :  { %v117_v37 = vsub.f32 0.0, %v113_v35 }
  0x48   :  { %v120_v38 = vmul.f32 1.442695, %v116_v36 }
  0x49   :  { %v122_v39 = vmul.f32 1.442695, %v117_v37 }
  0x4a   :  { %212 = vpow2.f32 %v120_v38 }
  0x4b   :  { %214 = vpow2.f32 %v122_v39 }
  0x57   :  { %v213_v46 = vpop.eup %212 }
  0x58   :  { %v215_v47 = vpop.eup %214  ;;  %v144_v49 = vsub.f32 1.0, %v213_v46 }
  0x59   :  { %v145_v51 = vsub.f32 1.0, %v215_v47 }
  0x5a   :  { %v148_v52 = vmul.f32 %v144_v49, %v144_v49 }
  0x5b   :  { %v149_v53 = vmul.f32 %v145_v51, %v145_v51 }
  0x5c   :  { %v152_v54 = vmul.f32 %v148_v52, %v140_v48 }
  0x5d   :  { %v153_v55 = vmul.f32 %v149_v53, %v141_v50 }
  0x5e   :  { %v156_v56 = vmul.f32 %v152_v54, %v112_v34 }
  0x5f   :  { %v157_v57 = vmul.f32 %v153_v55, %v113_v35 }
  0x61   :  { %v179_v58 = vadd.f32 %v157_v57, %v156_v56 }
  0x63   :  { %182 = vst [vmem:[#allocation7] sm:$0xff] %v179_v58 }
  0x64   :  { %267 = shalt.err (!%p264_p0)
}
  0x65   :  { %192 = dma.vmem_to_hbm [thread:$0]  %s190_s1, 128, %s313_s2, [#allocation4]  }
  0x66   :  { %280 = dma.done.wait [#allocation4], 128  }
  0x67   :  { %281 = vsyncadd [#allocation4], 4294967168 }
  0x68   :  { %196 = vsyncpa [#allocation3], 1 }
  0x69   :  { %197 = vsyncpa [#allocation6], 1 }
  0x6a   :  { %198 = vsyncpa [#allocation4], 1 }

</bundles_post_ra>
